<compile_context>
chip_gen: v6e
topology: v6e:2x2x1
jax: 0.10.0
libtpu: 0.0.40
codegen_flags: <defaults>
</compile_context>

<pallas_src>
import functools
import math

import jax
import jax.numpy as jnp
from jax.experimental import pallas as pl
from jax.experimental.pallas import tpu as pltpu


def _cdiv(a, b):
    return -(-a // b)


def _device_kind():
    try:
        return jax.devices()[0].device_kind.lower()
    except Exception:
        return ""


def _vmem_capacity_bytes():
    """Best-effort per-core VMEM capacity: Mosaic query, else device_kind, else 64 MiB."""
    try:
        cap = int(pltpu.get_tpu_info().vmem_capacity_bytes)
        if cap > 0:
            return cap
    except Exception:
        pass
    kind = _device_kind()
    if "v7" in kind:
        return 64 << 20
    if kind:
        return 128 << 20          # v4 / v5e / v5p / v6e: 128 MiB per core
    return 64 << 20               # unknown: assume the smallest


def _vmem_plan(budget_override, limit_override):
    cap = _vmem_capacity_bytes()
    limit = min(cap - (16 << 20), (cap * 3) // 4)   # v7x -> 48 MiB, 128 MiB parts -> 96 MiB
    limit = max(limit, 32 << 20)
    budget = (limit * 2) // 3                       # v7x -> 32 MiB, others -> 64 MiB
    if limit_override is not None:
        limit = int(limit_override)
    if budget_override is not None:
        budget = int(budget_override)
    return budget, limit


def _choose_tile_n(hw, batch, per_col_bytes, budget_bytes):
    """Lane-tile (multiple of 128) from the VMEM budget; ragged last tile allowed.

    hw >= 128 here.  tile_n <= floor(hw/128)*128 so every block starts inside
    the array (only the final block is partial / store-masked).
    """
    max_tiles = hw // 128
    budget_tiles = max(1, (budget_bytes // max(per_col_bytes, 1)) // 128)
    t = min(budget_tiles, max_tiles)
    t = max(t, min(4, max_tiles))                   # ~512-lane floor
    if batch == 1 and max_tiles >= 2:               # let both TCs share the pixels
        t = min(t, max(_cdiv(max_tiles, 2), min(4, max_tiles)))
    return t * 128


def _channel_att_kernel(w1_ref, b1_ref, w2_ref, b2_ref, im_ref, cv_ref, out_ref,
                        *, multiply_in_f32):
    # im_ref : (C_im, tN)
    # cv_ref / out_ref : (C_cv, D, tN)  or  (C_cv*D, tN) in the flattened layout
    # 1x1 conv #1 (BN folded into w1/b1) + ReLU; MXU accumulates in f32.
    h = jnp.dot(w1_ref[...], im_ref[...], preferred_element_type=jnp.float32)
    h = jnp.maximum(h + b1_ref[...], 0.0)

    # 1x1 conv #2 + sigmoid (w2/b2 are pre-replicated along D in the flat layout).
    att = jnp.dot(w2_ref[...], h, preferred_element_type=jnp.float32) + b2_ref[...]
    att = jax.nn.sigmoid(att)

    cv = cv_ref[...]
    if cv.ndim == 3:                      # (C_cv, D, tN): broadcast att over D
        att = att[:, None, :]
    if multiply_in_f32:                   # v5e + packed dtype: skip the pre-cast
        out_ref[...] = (att * cv.astype(jnp.float32)).astype(out_ref.dtype)
    else:                                 # v6e/v7x: multiply in cv's native dtype
        out_ref[...] = (att.astype(cv.dtype) * cv).astype(out_ref.dtype)


def channel_att_pallas(cv, im, w1, b1, w2, b2, *, tile_n=None, donate_cv=False,
                       vmem_budget_bytes=None, vmem_limit_bytes=None):
    """cv: (B, C_cv, D, H, W), im: (B, C_im, H, W)  (PyTorch NCDHW / NCHW)."""
    B, C_cv, D, H, W = cv.shape
    Bi, C_im, Hi, Wi = im.shape
    assert (B, H, W) == (Bi, Hi, Wi), "cv / im batch & spatial dims must match"
    C_h = w1.shape[0]
    HW = H * W

    cv_item = jnp.dtype(cv.dtype).itemsize
    im_item = jnp.dtype(im.dtype).itemsize

    # Sublane packing of cv's dtype (f32 -> 8, bf16 -> 16, int8/fp8 -> 32).  If
    # D doesn't fill whole packed sublanes, flatten (C_cv, D) into one dense row
    # axis and replicate w2/b2 rows so att already has one row per (c, d) pair.
    sublane_pack = 8 * max(1, 4 // cv_item)
    flatten_d = (D % sublane_pack) != 0

    # Free, contiguous reshapes -- no HBM transpose passes.
    im_r = im.reshape(B, C_im, HW)
    if flatten_d:
        cv_r = cv.reshape(B, C_cv * D, HW)
        w2_k = jnp.repeat(w2, D, axis=0)                   # (C_cv*D, C_h), tiny
        b2_k = jnp.repeat(b2, D).reshape(C_cv * D, 1)
        att_rows = C_cv * D
    else:
        cv_r = cv.reshape(B, C_cv, D, HW)
        w2_k = w2
        b2_k = b2.reshape(C_cv, 1)
        att_rows = C_cv
    b1_k = b1.reshape(C_h, 1)

    # Only pad when the whole pixel axis is smaller than one lane tile (tiny).
    hw_eff = HW
    if HW < 128:
        pad = 128 - HW
        cv_r = jnp.pad(cv_r, [(0, 0)] * (cv_r.ndim - 1) + [(0, pad)])
        im_r = jnp.pad(im_r, ((0, 0), (0, 0), (0, pad)))
        hw_eff = 128

    budget, vmem_limit = _vmem_plan(vmem_budget_bytes, vmem_limit_bytes)

    rows_cv = C_cv * D
    per_col = (4 * rows_cv * cv_item            # cv in + out, double-buffered
               + 2 * C_im * im_item             # im, double-buffered
               + 4 * (C_h + att_rows)           # f32 h / att temporaries
               + rows_cv * cv_item)             # cast / broadcast temp

    if tile_n is None:
        tile_n = _choose_tile_n(hw_eff, B, per_col, budget)
    else:
        assert tile_n % 128 == 0, "tile_n must be a multiple of 128"
        tile_n = min(tile_n, max(128, (hw_eff // 128) * 128))

    n_tiles = _cdiv(hw_eff, tile_n)             # ragged last tile is fine (masked)
    grid = (B, n_tiles)

    kind = _device_kind()
    is_v5e = ("v5 lite" in kind) or ("v5e" in kind) or ("v5lite" in kind)
    multiply_in_f32 = is_v5e and (jnp.dtype(cv.dtype) != jnp.dtype(jnp.float32))

    if flatten_d:
        cv_spec = pl.BlockSpec((None, C_cv * D, tile_n), lambda b, i: (b, 0, i))
        out_spec = pl.BlockSpec((None, C_cv * D, tile_n), lambda b, i: (b, 0, i))
        out_shape = jax.ShapeDtypeStruct((B, C_cv * D, hw_eff), cv.dtype)
    else:
        cv_spec = pl.BlockSpec((None, C_cv, D, tile_n), lambda b, i: (b, 0, 0, i))
        out_spec = pl.BlockSpec((None, C_cv, D, tile_n), lambda b, i: (b, 0, 0, i))
        out_shape = jax.ShapeDtypeStruct((B, C_cv, D, hw_eff), cv.dtype)

    kernel = functools.partial(_channel_att_kernel, multiply_in_f32=multiply_in_f32)

    alias_kwargs = {"input_output_aliases": {5: 0}} if donate_cv else {}

    out_r = pl.pallas_call(
        kernel,
        out_shape=out_shape,
        grid_spec=pltpu.PrefetchScalarGridSpec(
            num_scalar_prefetch=0,
            grid=grid,
            in_specs=[
                pl.BlockSpec((C_h, C_im), lambda b, i: (0, 0)),          # w1 (BN folded)
                pl.BlockSpec((C_h, 1), lambda b, i: (0, 0)),             # b1 (BN folded)
                pl.BlockSpec((att_rows, C_h), lambda b, i: (0, 0)),      # w2 (maybe D-replicated)
                pl.BlockSpec((att_rows, 1), lambda b, i: (0, 0)),        # b2
                pl.BlockSpec((None, C_im, tile_n), lambda b, i: (b, 0, i)),   # im tile
                cv_spec,                                                  # cv tile
            ],
            out_specs=out_spec,
        ),
        compiler_params=pltpu.CompilerParams(
            dimension_semantics=("parallel", "parallel"),
            vmem_limit_bytes=int(vmem_limit),
        ),
        **alias_kwargs,
    )(w1, b1_k, w2_k, b2_k, im_r, cv_r)

    if hw_eff != HW:
        out_r = out_r[..., :HW]
    return out_r.reshape(B, C_cv, D, H, W)      # free reshape back to NCDHW


def make_params(key, cv_chan, im_chan):
    """Deterministic parameter init mirroring SubModule.weight_init (eval-mode BN)."""
    C_h = im_chan // 2
    k1, k2, k3 = jax.random.split(key, 3)

    # Conv2d(im_chan -> C_h, 1x1, bias=False): normal(0, sqrt(2/(1*1*out)))
    w1 = jax.random.normal(k1, (C_h, im_chan), jnp.float32) * math.sqrt(2.0 / C_h)
    # BatchNorm2d eval: gamma=1, beta=0, mean=0, var=1, eps=1e-5 -> fold into w1/b1.
    eps = 1e-5
    w1_eff = w1 * (1.0 / math.sqrt(1.0 + eps))
    b1_eff = jnp.zeros((C_h,), jnp.float32)

    # Conv2d(C_h -> cv_chan, 1x1, bias=True): weight normal(0, sqrt(2/(1*1*out)))
    w2 = jax.random.normal(k2, (cv_chan, C_h), jnp.float32) * math.sqrt(2.0 / cv_chan)
    bound = 1.0 / math.sqrt(C_h)
    b2 = jax.random.uniform(k3, (cv_chan,), jnp.float32, -bound, bound)

    return w1_eff, b1_eff, w2, b2


def channel_att_reference(cv, im, w1, b1, w2, b2):
    """Pure-JAX reference of the same forward pass (correctness check)."""
    B, C_im, H, W = im.shape
    im_flat = im.reshape(B, C_im, H * W)
    h = jnp.maximum(jnp.einsum('oc,bcn->bon', w1, im_flat) + b1[None, :, None], 0.0)
    att = jax.nn.sigmoid(jnp.einsum('oc,bcn->bon', w2, h) + b2[None, :, None])
    att = att.reshape(B, -1, H, W)
    return att[:, :, None, :, :] * cv


if __name__ == "__main__":
    key = jax.random.PRNGKey(0)
    k_cv, k_im, k_par, k_cv2, k_im2, k_par2 = jax.random.split(key, 6)

    # Case 1: aligned pixel count (HW % 128 == 0), f32, D a sublane multiple.
    B, C_cv, C_im, D, H, W = 2, 8, 16, 8, 16, 16
    cv = jax.random.normal(k_cv, (B, C_cv, D, H, W), jnp.float32)
    im = jax.random.normal(k_im, (B, C_im, H, W), jnp.float32)
    w1, b1, w2, b2 = make_params(k_par, C_cv, C_im)
    out = jax.block_until_ready(channel_att_pallas(cv, im, w1, b1, w2, b2))
    ref = jax.block_until_ready(channel_att_reference(cv, im, w1, b1, w2, b2))
    assert out.shape == (B, C_cv, D, H, W)
    assert jnp.allclose(out, ref, atol=1e-5, rtol=1e-5), "case 1 mismatch vs reference"

    # Case 2: ragged pixel count (HW % 128 != 0) and D not a sublane multiple
    # -> exercises the masked last tile and the flattened (C_cv*D, HW) layout.
    B2, C_cv2, C_im2, D2, H2, W2 = 1, 8, 16, 5, 13, 11
    cv2 = jax.random.normal(k_cv2, (B2, C_cv2, D2, H2, W2), jnp.float32)
    im2 = jax.random.normal(k_im2, (B2, C_im2, H2, W2), jnp.float32)
    p2 = make_params(k_par2, C_cv2, C_im2)
    out2 = jax.block_until_ready(channel_att_pallas(cv2, im2, *p2))
    ref2 = jax.block_until_ready(channel_att_reference(cv2, im2, *p2))
    assert out2.shape == (B2, C_cv2, D2, H2, W2)
    assert jnp.allclose(out2, ref2, atol=1e-5, rtol=1e-5), "case 2 mismatch vs reference"

    print("KERNEL_OK")
</pallas_src>

<mosaic_0001>
module attributes {stable_mosaic.version = 11 : i64} {
  func.func @_channel_att_kernel(%arg0: i32, %arg1: i32, %arg2: memref<8x16xf32, #tpu.memory_space<vmem>>, %arg3: memref<8x1xf32, #tpu.memory_space<vmem>>, %arg4: memref<8x8xf32, #tpu.memory_space<vmem>>, %arg5: memref<8x1xf32, #tpu.memory_space<vmem>>, %arg6: memref<1x16x256xf32, #tpu.memory_space<vmem>>, %arg7: memref<1x8x8x256xf32, #tpu.memory_space<vmem>>, %arg8: memref<1x8x8x256xf32, #tpu.memory_space<vmem>>) attributes {dimension_semantics = [#tpu.dimension_semantics<parallel>, #tpu.dimension_semantics<parallel>], iteration_bounds = array<i64: 2, 1>, scalar_prefetch = 0 : i64, scratch_operands = 0 : i64, tpu.core_type = #tpu.core_type<tc>, window_params = [{pipeline_mode = #tpu.pipeline_mode<synchronous>, transform_indices = @transform_0, window_bounds = array<i64: 8, 16>}, {pipeline_mode = #tpu.pipeline_mode<synchronous>, transform_indices = @transform_1, window_bounds = array<i64: 8, 1>}, {pipeline_mode = #tpu.pipeline_mode<synchronous>, transform_indices = @transform_2, window_bounds = array<i64: 8, 8>}, {pipeline_mode = #tpu.pipeline_mode<synchronous>, transform_indices = @transform_3, window_bounds = array<i64: 8, 1>}, {transform_indices = @transform_4, window_bounds = array<i64: 1, 16, 256>}, {transform_indices = @transform_5, window_bounds = array<i64: 1, 8, 8, 256>}, {transform_indices = @transform_6, window_bounds = array<i64: 1, 8, 8, 256>}]} {
    %c0 = arith.constant 0 : index
    %c0_0 = arith.constant 0 : index
    %0 = vector.load %arg2[%c0, %c0_0] : memref<8x16xf32, #tpu.memory_space<vmem>>, vector<8x16xf32>
    %c0_1 = arith.constant 0 : index
    %c0_2 = arith.constant 0 : index
    %c0_3 = arith.constant 0 : index
    %1 = vector.load %arg6[%c0_1, %c0_2, %c0_3] : memref<1x16x256xf32, #tpu.memory_space<vmem>>, vector<1x16x256xf32>
    %2 = vector.shape_cast %1 : vector<1x16x256xf32> to vector<16x256xf32>
    %cst = arith.constant dense<0.000000e+00> : vector<8x256xf32>
    %3 = tpu.matmul %0, %2, %cst {dimension_numbers = #tpu.dot_dimension_numbers<[1], [0], [0], [1], [0, 0, 1, 1], [], []>} : vector<8x16xf32>, vector<16x256xf32>, vector<8x256xf32> -> vector<8x256xf32>
    %c0_4 = arith.constant 0 : index
    %c0_5 = arith.constant 0 : index
    %4 = vector.load %arg3[%c0_4, %c0_5] : memref<8x1xf32, #tpu.memory_space<vmem>>, vector<8x1xf32>
    %5 = vector.broadcast %4 : vector<8x1xf32> to vector<8x256xf32>
    %6 = arith.addf %3, %5 : vector<8x256xf32>
    %cst_6 = arith.constant 0.000000e+00 : f32
    %7 = vector.broadcast %cst_6 : f32 to vector<8x256xf32>
    %8 = arith.maximumf %6, %7 : vector<8x256xf32>
    %c0_7 = arith.constant 0 : index
    %c0_8 = arith.constant 0 : index
    %9 = vector.load %arg4[%c0_7, %c0_8] : memref<8x8xf32, #tpu.memory_space<vmem>>, vector<8x8xf32>
    %cst_9 = arith.constant dense<0.000000e+00> : vector<8x256xf32>
    %10 = tpu.matmul %9, %8, %cst_9 {dimension_numbers = #tpu.dot_dimension_numbers<[1], [0], [0], [1], [0, 0, 1, 1], [], []>} : vector<8x8xf32>, vector<8x256xf32>, vector<8x256xf32> -> vector<8x256xf32>
    %c0_10 = arith.constant 0 : index
    %c0_11 = arith.constant 0 : index
    %11 = vector.load %arg5[%c0_10, %c0_11] : memref<8x1xf32, #tpu.memory_space<vmem>>, vector<8x1xf32>
    %12 = vector.broadcast %11 : vector<8x1xf32> to vector<8x256xf32>
    %13 = arith.addf %10, %12 : vector<8x256xf32>
    %14 = arith.negf %13 : vector<8x256xf32>
    %15 = math.exp %14 : vector<8x256xf32>
    %cst_12 = arith.constant 1.000000e+00 : f32
    %16 = vector.broadcast %cst_12 : f32 to vector<8x256xf32>
    %17 = arith.addf %16, %15 : vector<8x256xf32>
    %18 = arith.divf %16, %17 : vector<8x256xf32>
    %c0_13 = arith.constant 0 : index
    %c0_14 = arith.constant 0 : index
    %c0_15 = arith.constant 0 : index
    %c0_16 = arith.constant 0 : index
    %19 = vector.load %arg7[%c0_13, %c0_14, %c0_15, %c0_16] : memref<1x8x8x256xf32, #tpu.memory_space<vmem>>, vector<1x8x8x256xf32>
    %20 = vector.shape_cast %19 : vector<1x8x8x256xf32> to vector<8x8x256xf32>
    %21 = vector.shape_cast %18 : vector<8x256xf32> to vector<8x1x256xf32>
    %22 = vector.broadcast %21 : vector<8x1x256xf32> to vector<8x8x256xf32>
    %23 = arith.mulf %22, %20 : vector<8x8x256xf32>
    %c0_17 = arith.constant 0 : index
    %c0_18 = arith.constant 0 : index
    %c0_19 = arith.constant 0 : index
    %c0_20 = arith.constant 0 : index
    %24 = vector.load %arg8[%c0_17, %c0_18, %c0_19, %c0_20] : memref<1x8x8x256xf32, #tpu.memory_space<vmem>>, vector<1x8x8x256xf32>
    %25 = vector.shape_cast %24 : vector<1x8x8x256xf32> to vector<8x8x256xf32>
    %26 = vector.shape_cast %23 : vector<8x8x256xf32> to vector<1x8x8x256xf32>
    tpu.vector_store %arg8[%c0_17, %c0_18, %c0_19, %c0_20], %26 {strides = array<i32>} : memref<1x8x8x256xf32, #tpu.memory_space<vmem>>, vector<1x8x8x256xf32>,
    return
  }
  func.func @transform_0(%arg0: i32, %arg1: i32) -> (i32, i32) {
    %c0_i32 = arith.constant 0 : i32
    %c0_i32_0 = arith.constant 0 : i32
    %c0_i32_1 = arith.constant 0 : i32
    return %c0_i32, %c0_i32_0 : i32, i32
  }
  func.func @transform_1(%arg0: i32, %arg1: i32) -> (i32, i32) {
    %c0_i32 = arith.constant 0 : i32
    %c0_i32_0 = arith.constant 0 : i32
    %c0_i32_1 = arith.constant 0 : i32
    return %c0_i32, %c0_i32_0 : i32, i32
  }
  func.func @transform_2(%arg0: i32, %arg1: i32) -> (i32, i32) {
    %c0_i32 = arith.constant 0 : i32
    %c0_i32_0 = arith.constant 0 : i32
    %c0_i32_1 = arith.constant 0 : i32
    return %c0_i32, %c0_i32_0 : i32, i32
  }
  func.func @transform_3(%arg0: i32, %arg1: i32) -> (i32, i32) {
    %c0_i32 = arith.constant 0 : i32
    %c0_i32_0 = arith.constant 0 : i32
    %c0_i32_1 = arith.constant 0 : i32
    return %c0_i32, %c0_i32_0 : i32, i32
  }
  func.func @transform_4(%arg0: i32, %arg1: i32) -> (i32, i32, i32) {
    %c0_i32 = arith.constant 0 : i32
    %c0_i32_0 = arith.constant 0 : i32
    return %arg0, %c0_i32, %arg1 : i32, i32, i32
  }
  func.func @transform_5(%arg0: i32, %arg1: i32) -> (i32, i32, i32, i32) {
    %c0_i32 = arith.constant 0 : i32
    %c0_i32_0 = arith.constant 0 : i32
    %c0_i32_1 = arith.constant 0 : i32
    return %arg0, %c0_i32, %c0_i32_0, %arg1 : i32, i32, i32, i32
  }
  func.func @transform_6(%arg0: i32, %arg1: i32) -> (i32, i32, i32, i32) {
    %c0_i32 = arith.constant 0 : i32
    %c0_i32_0 = arith.constant 0 : i32
    %c0_i32_1 = arith.constant 0 : i32
    return %arg0, %c0_i32, %c0_i32_0, %arg1 : i32, i32, i32, i32
  }
}

</mosaic_0001>

<bundles_post_ra>
// kernel: tpu_custom_call.1
= control target key start
LH: loop header
LB: loop body
LE: loop exit
PB: predicated region body
PF: predicated region fallthrough
CT: control target
= control target key end

     0   :  { %s1371_s0 = inlined_call_operand.vmem [shape: f32[8,16], index: 0, kind: input, shape index: {}]   ;;  %s1372_s1 = inlined_call_operand.vmem [shape: f32[8,1], index: 1, kind: input, shape index: {}]   ;;  %s1373_s2 = inlined_call_operand.vmem [shape: f32[8,8], index: 2, kind: input, shape index: {}]   ;;  %s1374_s3 = inlined_call_operand.vmem [shape: f32[8,1], index: 3, kind: input, shape index: {}]   ;;  %s1375_s4 = inlined_call_operand.hbm [shape: f32[2,16,256], index: 4, kind: input, shape index: {}]   ;;  %s1376_s5 = inlined_call_operand.hbm [shape: f32[2,8,8,256], index: 5, kind: input, shape index: {}]   ;;  %s1377_s6 = inlined_call_operand.hbm [shape: f32[2,8,8,256], index: 6, kind: output, shape index: {}]  }
   0x1   :  { %1380 = sst [smem:[#allocation14_spill]] %s1375_s4 }
   0x2   :  { %11 = vsyncpa [#allocation3], 0 }
   0x3   :  { %13 = vsyncpa [#allocation3 + $0x1], 0 }
   0x4   :  { %14 = vsyncpa [#allocation6], 0 }
   0x5   :  { %16 = vsyncpa [#allocation6 + $0x1], 0 }
   0x6   :  { %17 = vsyncpa [#allocation4], 0 }
   0x7   :  { %19 = vsyncpa [#allocation4 + $0x1], 0  ;;  %s1122_s21 = smov 0   ;;  %s1124_s22 = smov 0  }
   0x8   :  { %s1126_s23 = smov 0   ;;  %s1128_s24 = smov 0  }
   0x9   :  { %s1130_s25 = smov 0   ;;  %s1132_s26 = smov 0  }
   0xa LB: > { %1381 = sst [smem:[#allocation11_spill]] %s1063_s23  ;;  %s826_s27 = sadd.s32 4294967295, %s1075_s26   ;;  %s1075_s26 = sphi %s1132_s26, %s25_s26   ;;  %s1071_s25 = sphi %s1130_s25, %s1397_s25   ;;  %s1067_s24 = sphi %s1128_s24, %s1396_s24   ;;  %s1063_s23 = sphi %s1126_s23, %s1392_s23   ;;  %s1059_s22 = sphi %s1124_s22, %s1395_s22   ;;  %s1055_s21 = sphi %s1122_s21, %s1394_s21  }
   0xb   : > { %s827_s28 = sadd.s32 4294967294, %s1075_s26   ;;  %s37_s29 = sadd.s32 1, %s1071_s25 }
   0xc   : > { %s130_s30 = sadd.s32 1, %s1063_s23  ;;  %p39_p0 = scmp.ge.s32.totalorder %s37_s29, 2 }
   0xd   : > { %p137_p1 = scmp.ne.s32.totalorder %s1063_s23, %s1059_s22  ;;  %p138_p2 = scmp.eq.s32.totalorder %s1075_s26, 0 }
   0xe   : > { %p143_p3 = scmp.ne.s32.totalorder %s1059_s22, %s1055_s21  ;;  %s1399_s29 = smov (%p39_p0, %s37_s29), 0 }
   0xf   : > { %1382 = sst [smem:[#allocation12_spill]] %s1399_s29  ;;  %p1163_p4 = por %p138_p2, %p137_p1 }
  0x10   : > { %p144_p5 = scmp.eq.s32.totalorder %s826_s27, 0  ;;  %s125_s8 = ssub.s32 %s1071_s25, %s1399_s29 }
  0x11   : > { %p197_p6 = scmp.eq.s32.totalorder %s826_s27, 1  ;;  %p128_p7 = scmp.eq.s32.totalorder %s125_s8, 0 }
  0x12   : > { %p1169_p8 = por %p144_p5, %p143_p3  ;;  %p203_p10 = scmp.eq.s32.totalorder %s827_s28, 1 }
  0x13   : > { %p1173_p9 = por %p197_p6, %p137_p1  ;;  %p829_p12 = scmp.ge.s32.totalorder %s1075_s26, 2 }
  0x14   : > { %s1178_s11 = scalar_select %p128_p7, %s1063_s23, %s130_s30  }
  0x15   : > { %p1180_p11 = por %p203_p10, %p143_p3  ;;  %p869_p13 = scmp.lt.s32.totalorder %s1075_s26, 2 }
  0x16   : > { %1386 = sst [smem:[#allocation13_spill]] %s1178_s11  ;;  %s1187_s13 = sand.u32 1, %s1063_s23  }
  0x17   : > { %s830_s14 = sshll.u32 %s1187_s13, 5  ;;  %s849_s15 = sshll.u32 %s1071_s25, 9 }
  0x18   : > { %s1388_s4 = sld [smem:[#allocation14_spill]]  ;;  %s239_s19 = scalar_lea.vmem [#allocation2], %s830_s14 }
  0x19   : > { %s248_s20 = sshll.u32 %s239_s19, 4  ;;  %p1196_p0 = pnand %p869_p13, %p1163_p4  ;;  %s249_s20 = int_to_ptr.vmem [resolvable:$true] %s248_s20 }
  0x1a   : > { %p836_p1 = scmp.ge.s32.totalorder %s1075_s26, 1  ;;  %s236_s28 = scalar_lea.sflag [#allocation3], %s1187_s13 }
  0x1b   : > { %p937_p2 = pneg %p1196_p0  ;;  %s948_s30 = scalar_lea.vmem %s249_s20, 512 }
  0x1c   : > { %p949_p3 = scmp.ne.s32.totalorder %s249_s20, %s948_s30  ;;  %s1077_s8 = smov [#allocation2]  }
  0x1d   : > { %s953_s14 = sshll.u32 %s1077_s8, 4  ;;  %s954_s14 = int_to_ptr.vmem [resolvable:$false] %s953_s14 }
  0x1e   : > { %s247_s18 = scalar_lea.hbm %s1388_s4, %s849_s15  ;;  %p951_p5 = pnand %p949_p3, %p937_p2 }
  0x1f   : > { %s955_s7 = scalar_lea.vmem %s954_s14, 1024  ;;  %p956_p4 = scmp.lt.s32.totalorder %s249_s20, %s954_s14 }
  0x20   : > { %p952_p6 = pneg %p951_p5  ;;  %p957_p7 = scmp.lt.s32.totalorder %s955_s7, %s948_s30 }
  0x22   : > { %p958_p10 = por %p957_p7, %p956_p4 }
  0x24   : > { %p959_p13 = pnand %p958_p10, %p952_p6 }
  0x26   : > { %962 = shalt.err (!%p959_p13)
}
  0x27   : > { %s1078_s15 = smov 256   ;;  %s1079_s16 = smov 16  }
  0x28   : > { %861 = dma.hbm_to_vmem [thread:$0]  (!%p1196_p0), %s247_s18, 512, %s249_s20, %s236_s28, %s1078_s15, %s1078_s15, %s1079_s16  }
  0x29   : > { %p279_p3 = scmp.lt.s32.totalorder %s1075_s26, 3  ;;  %s833_s17 = sshll.u32 %s1187_s13, 7 }
  0x2a   : > { %s850_s19 = sshll.u32 %s1071_s25, 11  ;;  %s262_s4 = scalar_lea.vmem [#allocation5], %s833_s17 }
  0x2b   : > { %p1214_p5 = pnand %p836_p1, %p279_p3  ;;  %s270_s7 = scalar_lea.hbm %s1376_s5, %s850_s19 }
  0x2c   : > { %s271_s29 = sshll.u32 %s262_s4, 4  ;;  %s259_s11 = scalar_lea.sflag [#allocation6], %s1187_s13  ;;  %s272_s29 = int_to_ptr.vmem [resolvable:$true] %s271_s29 }
  0x2d   : > { %s976_s23 = scalar_lea.vmem %s272_s29, 2048  ;;  %s1080_s18 = smov [#allocation5]  }
  0x2e   : > { %p977_p6 = scmp.ne.s32.totalorder %s272_s29, %s976_s23  ;;  %s981_s20 = sshll.u32 %s1080_s18, 4  ;;  %s982_s20 = int_to_ptr.vmem [resolvable:$false] %s981_s20 }
  0x2f   : > { %s983_s28 = scalar_lea.vmem %s982_s20, 4096  ;;  %p984_p1 = scmp.lt.s32.totalorder %s272_s29, %s982_s20 }
  0x30   : > { %p979_p4 = pnand %p977_p6, %p937_p2  ;;  %p985_p10 = scmp.lt.s32.totalorder %s983_s28, %s976_s23 }
  0x32   : > { %p980_p7 = pneg %p979_p4  ;;  %p986_p13 = por %p985_p10, %p984_p1 }
  0x34   : > { %p987_p3 = pnand %p986_p13, %p980_p7 }
  0x36   : > { %990 = shalt.err (!%p987_p3)
}
  0x37   : > { %864 = dma.hbm_to_vmem [thread:$0]  (!%p1196_p0), %s270_s7, 2048, %s272_s29, %s259_s11, %s1078_s15, %s1078_s15, %s1079_s16  }
  0x38   : > { %283 = sbr.rel (%p1214_p5) target bundleno = 536 (0x218), region = 44  ;;  %s1230_s4 = sand.u32 (!%p1214_p5), 1, %s1059_s22  }
  0x39   : > { %s837_s13 = sshll.u32 (!%p1214_p5), %s1230_s4, 5  ;;  %s286_s17 = scalar_lea.sflag (!%p1214_p5), [#allocation3], %s1230_s4 }
  0x3a   : > { %s289_s19 = scalar_lea.vmem (!%p1214_p5), [#allocation2], %s837_s13 }
  0x3d   : > { %1042 = dma.done.wait (%p1169_p8), %s286_s17, 512  }
  0x3e   : > { %1044 = vsyncadd (%p1169_p8), %s286_s17, 4294966784  ;;  %s838_s23 = sshll.u32 %s1230_s4, 7  ;;  %s295_s29 = scalar_lea.sflag [#allocation6], %s1230_s4 }
  0x3f   : > { %s1242_s11 = scalar_lea.vmem [#allocation5], %s838_s23 }
  0x40   : > { %1046 = dma.done.wait (%p1169_p8), %s295_s29, 2048  }
  0x41   : > { %1048 = vsyncadd (%p1169_p8), %s295_s29, 4294965248  ;;  %v1081_v0 = vmov 0.0   ;;  %v1082_v1 = vmov 0   ;;  %v339_v2 = vld [vmem:[%s289_s19 + $0x18] sm:$0xff]  ;;  %v338_v3 = vld [vmem:[%s289_s19 + $0x10] sm:$0xff]  ;;  %vm346_vm0 = vcmask 130048   ;;  %v540_v30 = vlaneseq }
  0x42   : > { %414 = vmatprep.mubr.f32.mxu0 %v1081_v0  ;;  %926 = vset.pattern.permute.xlu0 %v1082_v1  ;;  %v337_v4 = vld [vmem:[%s289_s19 + $0x8] sm:$0xff]  ;;  %v336_v5 = vld [vmem:[%s289_s19] sm:$0xff]  ;;  %vm430_vm1 = vcmask 64512   ;;  %v1083_v28 = vmov 1966171168   ;;  %v519_v56 = vld [vmem:[%s1242_s11 + $0x10] sm:$0xff] }
  0x43   : > { %498 = vmatprep.mubr.f32.mxu1 %v1081_v0  ;;  %378 = vmatprep.subr.mxu0 %v339_v2  ;;  %v340_v6 = vld [vmem:[%s1372_s1] sm:$0xff]  ;;  %v538_v29 = vunpack.c.l.s4 %v1083_v28  ;;  %v541_v32 = vshrl.u32 %v540_v30, 7  ;;  %v518_v51 = vld [vmem:[%s1242_s11 + $0x8] sm:$0xff]  ;;  %v520_v57 = vld [vmem:[%s1242_s11 + $0x18] sm:$0xff]  ;;  %s851_s18 = sshll.u32 %s1067_s24, 11  ;;  %s1297_s20 = scalar_lea.vmem [#allocation7], %s838_s23 }
  0x44   : > { %379 = vmatpush1.msra.mxu0 %v338_v3  ;;  %v335_v7 = vld [vmem:[%s1371_s0] sm:$0xff]  ;;  %343 = vperm.xlu0 %926, %v340_v6   ;;  %v522_v63 = vld [vmem:[%s1242_s11 + $0x28] sm:$0xff]  ;;  %v523_v0 = vld [vmem:[%s1242_s11 + $0x30] sm:$0xff]  ;;  %s713_s28 = sshll.u32 %s1297_s20, 4  ;;  %s1311_s17 = scalar_lea.hbm %s1377_s6, %s851_s18  ;;  %s1313_s28 = int_to_ptr.vmem [resolvable:$true] %s713_s28 }
  0x45   : > { %380 = vmatprep.subr.mxu0 %v337_v4  ;;  %v424_v8 = vld [vmem:[%s1374_s3] sm:$0xff]  ;;  %v539_v31 = vunpack.c.0.s8 %v538_v29  ;;  %v1260_v40 = vsub.s32 0, %v541_v32  ;;  %v1262_v41 = vsub.s32 1, %v541_v32  ;;  %v524_v1 = vld [vmem:[%s1242_s11 + $0x38] sm:$0xff]  ;;  %s698_s19 = scalar_lea.sflag [#allocation4], %s1230_s4  ;;  %s991_s23 = scalar_lea.vmem %s1313_s28, 2048 }
  0x46   : > { %381 = vmatpush1.msra.mxu0 %v336_v5  ;;  %v423_v16 = vld [vmem:[%s1373_s2] sm:$0xff]  ;;  %p992_p8 = scmp.ne.s32.totalorder %s1313_s28, %s991_s23  ;;  %s1084_s29 = smov [#allocation7]  }
  0x47   : > { %840 = vmatmul.mubr.msk.f32.vlgmr.msra.gmra.mxu0 %vm346_vm0, %v335_v7  ;;  %v542_v34 = vsub.s32 %v539_v31, %v541_v32  ;;  %v517_v50 = vld [vmem:[%s1242_s11] sm:$0xff]  ;;  %v526_v7 = vld [vmem:[%s1242_s11 + $0x48] sm:$0xff] }
  0x48   : > { %427 = vperm.xlu0 %926, %v424_v8   ;;  %v521_v58 = vld [vmem:[%s1242_s11 + $0x20] sm:$0xff]  ;;  %v527_v8 = vld [vmem:[%s1242_s11 + $0x50] sm:$0xff]  ;;  %p993_p0 = pnand %p992_p8, %p1173_p9 }
  0x49   : > { %v525_v6 = vld [vmem:[%s1242_s11 + $0x40] sm:$0xff] }
  0x4a   : > { %p994_p2 = pneg %p993_p0 }
  0xbf   : > { %v344_v10 = vpop.permute.xlu0 %343 }
  0xc3   : > { %v428_v17 = vpop.permute.xlu0 %427 }
 0x107   : > { %v416_v9 = vpop.f32.mrf.mxu0 }
 0x108   : > { %v417_v11 = vadd.f32 %v416_v9, %v344_v10 }
 0x109   : > { %v418_v12 = vpop.f32.mrf.mxu0 }
 0x10a   : > { %v419_v13 = vadd.f32 %v418_v12, %v344_v10  ;;  %v421_v15 = vmax.f32 %v417_v11, 0.0 }
 0x10c   : > { %v422_v14 = vmax.f32 %v419_v13, 0.0  ;;  %v528_v13 = vld [vmem:[%s1242_s11 + $0x58] sm:$0xff] }
 0x10e   : > { %464 = vmatprep.subr.mxu1 %v422_v14  ;;  %v529_v14 = vld [vmem:[%s1242_s11 + $0x60] sm:$0xff] }
 0x10f   : > { %465 = vmatpush1.msra.mxu1 %v421_v15  ;;  %v530_v15 = vld [vmem:[%s1242_s11 + $0x68] sm:$0xff] }
 0x110   : > { %841 = vmatmul.mubr.msk.f32.vlgmr.msra.gmra.mxu1 %vm430_vm1, %v423_v16 }
 0x1d0   : > { %v500_v18 = vpop.f32.mrf.mxu1 }
 0x1d1   : > { %v501_v19 = vadd.f32 %v500_v18, %v428_v17 }
 0x1d2   : > { %v502_v20 = vpop.f32.mrf.mxu1 }
 0x1d3   : > { %v842_v21 = vmul.f32 -1.442695, %v501_v19  ;;  %v503_v22 = vadd.f32 %v502_v20, %v428_v17  ;;  %v531_v20 = vld [vmem:[%s1242_s11 + $0x70] sm:$0xff] }
 0x1d5   : > { %927 = vpow2.f32 %v842_v21  ;;  %v843_v23 = vmul.f32 -1.442695, %v503_v22  ;;  %v532_v21 = vld [vmem:[%s1242_s11 + $0x78] sm:$0xff]  ;;  %s995_s11 = sshll.u32 %s1084_s29, 4  ;;  %s996_s11 = int_to_ptr.vmem [resolvable:$false] %s995_s11 }
 0x1d6   : > { %s997_s27 = scalar_lea.vmem %s996_s11, 4096  ;;  %p998_p5 = scmp.lt.s32.totalorder %s1313_s28, %s996_s11 }
 0x1d7   : > { %929 = vpow2.f32 %v843_v23  ;;  %p999_p6 = scmp.lt.s32.totalorder %s997_s27, %s991_s23 }
 0x1d9   : > { %p1000_p4 = por %p999_p6, %p998_p5 }
 0x1db   : > { %p1001_p7 = pnand %p1000_p4, %p994_p2 }
 0x1e2   : > { %v928_v24 = vpop.eup %927 }
 0x1e3   : > { %v511_v25 = vadd.f32 1.0, %v928_v24 }
 0x1e4   : > { %v930_v26 = vpop.eup %929 }
 0x1e5   : > { %v512_v27 = vadd.f32 1.0, %v930_v26  ;;  %931 = vrcp.f32 %v511_v25 }
 0x1e7   : > { %933 = vrcp.f32 %v512_v27 }
 0x1f2   : > { %v932_v33 = vpop.eup %931 }
 0x1f4   : > { %v934_v35 = vpop.eup %933 }
 0x1f5   : > { %v535_v36 = vcombine.low %v932_v33, %v934_v35  ;;  %v536_v37 = vcombine.high %v932_v33, %v934_v35 }
 0x1f7   : > { %v543_v38 = vrot.slane %v535_v36, %v542_v34  ;;  %v550_v39 = vrot.slane %v536_v37, %v542_v34 }
 0x1f9   : > { %v551_v42 = vcombine.high %v543_v38, %v543_v38  ;;  %v552_v43 = vcombine.high %v550_v39, %v550_v39  ;;  %v559_v44 = vrot.slane %v543_v38, %v542_v34  ;;  %v566_v45 = vrot.slane %v550_v39, %v542_v34 }
 0x1fb   : > { %v573_v46 = vrot.slane %v551_v42, %v542_v34  ;;  %v580_v47 = vrot.slane %v552_v43, %v542_v34  ;;  %v581_v48 = vcombine.high %v559_v44, %v559_v44  ;;  %v582_v49 = vcombine.high %v566_v45, %v566_v45 }
 0x1fc   : > { %v588_v52 = vrot.slane %v559_v44, %v1260_v40  ;;  %v592_v53 = vrot.slane %v559_v44, %v1262_v41  ;;  %v620_v54 = vrot.slane %v566_v45, %v1260_v40  ;;  %v624_v55 = vrot.slane %v566_v45, %v1262_v41 }
 0x1fd   : > { %v583_v59 = vcombine.high %v573_v46, %v573_v46  ;;  %v584_v60 = vcombine.high %v580_v47, %v580_v47  ;;  %v596_v61 = vrot.slane %v573_v46, %v1260_v40  ;;  %v600_v62 = vrot.slane %v573_v46, %v1262_v41 }
 0x1fe   : > { %v604_v2 = vrot.slane %v581_v48, %v1260_v40  ;;  %v608_v3 = vrot.slane %v581_v48, %v1262_v41  ;;  %v628_v4 = vrot.slane %v580_v47, %v1260_v40  ;;  %v632_v5 = vrot.slane %v580_v47, %v1262_v41 }
 0x1ff   : > { %v612_v9 = vrot.slane %v583_v59, %v1260_v40  ;;  %v616_v10 = vrot.slane %v583_v59, %v1262_v41  ;;  %v636_v11 = vrot.slane %v582_v49, %v1260_v40  ;;  %v640_v12 = vrot.slane %v582_v49, %v1262_v41 }
 0x200   : > { %v644_v16 = vrot.slane %v584_v60, %v1260_v40  ;;  %v648_v17 = vrot.slane %v584_v60, %v1262_v41  ;;  %v665_v18 = vmul.f32 %v588_v52, %v517_v50  ;;  %v666_v19 = vmul.f32 %v592_v53, %v518_v51 }
 0x201   : > { %v667_v22 = vmul.f32 %v596_v61, %v519_v56  ;;  %v668_v23 = vmul.f32 %v600_v62, %v520_v57  ;;  %v669_v24 = vmul.f32 %v604_v2, %v521_v58  ;;  %v670_v25 = vmul.f32 %v608_v3, %v522_v63 }
 0x202   : > { %v671_v26 = vmul.f32 %v612_v9, %v523_v0  ;;  %v672_v27 = vmul.f32 %v616_v10, %v524_v1  ;;  %v673_v28 = vmul.f32 %v620_v54, %v525_v6  ;;  %v674_v29 = vmul.f32 %v624_v55, %v526_v7  ;;  %681 = vst [vmem:[%s1297_s20] sm:$0xff] %v665_v18 }
 0x203   : > { %682 = vst [vmem:[%s1297_s20 + $0x8] sm:$0xff] %v666_v19  ;;  %v675_v30 = vmul.f32 %v628_v4, %v527_v8  ;;  %v676_v31 = vmul.f32 %v632_v5, %v528_v13  ;;  %v677_v32 = vmul.f32 %v636_v11, %v529_v14  ;;  %v678_v33 = vmul.f32 %v640_v12, %v530_v15 }
 0x204   : > { %683 = vst [vmem:[%s1297_s20 + $0x10] sm:$0xff] %v667_v22  ;;  %684 = vst [vmem:[%s1297_s20 + $0x18] sm:$0xff] %v668_v23  ;;  %v679_v34 = vmul.f32 %v644_v16, %v531_v20  ;;  %v680_v35 = vmul.f32 %v648_v17, %v532_v21 }
 0x205   : > { %685 = vst [vmem:[%s1297_s20 + $0x20] sm:$0xff] %v669_v24  ;;  %686 = vst [vmem:[%s1297_s20 + $0x28] sm:$0xff] %v670_v25 }
 0x206   : > { %687 = vst [vmem:[%s1297_s20 + $0x30] sm:$0xff] %v671_v26  ;;  %688 = vst [vmem:[%s1297_s20 + $0x38] sm:$0xff] %v672_v27 }
 0x207   : > { %689 = vst [vmem:[%s1297_s20 + $0x40] sm:$0xff] %v673_v28  ;;  %690 = vst [vmem:[%s1297_s20 + $0x48] sm:$0xff] %v674_v29 }
 0x208   : > { %691 = vst [vmem:[%s1297_s20 + $0x50] sm:$0xff] %v675_v30  ;;  %692 = vst [vmem:[%s1297_s20 + $0x58] sm:$0xff] %v676_v31 }
 0x209   : > { %693 = vst [vmem:[%s1297_s20 + $0x60] sm:$0xff] %v677_v32  ;;  %694 = vst [vmem:[%s1297_s20 + $0x68] sm:$0xff] %v678_v33 }
 0x20a   : > { %695 = vst [vmem:[%s1297_s20 + $0x70] sm:$0xff] %v679_v34  ;;  %696 = vst [vmem:[%s1297_s20 + $0x78] sm:$0xff] %v680_v35 }
 0x20b   : > { %1004 = shalt.err (!%p1001_p7)
}
 0x20c   : > { %s1005_s15 = scalar_lea.hbm %s1311_s17, 2048  ;;  %s1009_s9 = scalar_lea.hbm %s1377_s6, 4096 }
 0x20d   : > { %p1006_p1 = scmp.ne.s32.totalorder %s1311_s17, %s1005_s15  ;;  %p1010_p3 = scmp.lt.s32.totalorder %s1311_s17, %s1377_s6 }
 0x20e   : > { %p1011_p8 = scmp.lt.s32.totalorder %s1009_s9, %s1005_s15 }
 0x20f   : > { %p1007_p10 = pnand %p1006_p1, %p1173_p9 }
 0x210   : > { %p1012_p0 = por %p1011_p8, %p1010_p3 }
 0x211   : > { %p1008_p13 = pneg %p1007_p10 }
 0x213   : > { %p1013_p2 = pnand %p1012_p0, %p1008_p13 }
 0x215   : > { %1016 = shalt.err (!%p1013_p2)
}
 0x216   : > { %s1085_s7 = smov 256   ;;  %s1086_s18 = smov 16  }
 0x217   : > { %856 = dma.vmem_to_hbm [thread:$0]  (%p1173_p9), %s1313_s28, 2048, %s1311_s17, %s698_s19, %s1085_s7, %s1085_s7, %s1086_s18  }
 0x218 PF: > { %s728_s20 = sand.u32 1, %s1055_s21   ;;  %p866_p5 = pnand %p829_p12, %p1180_p11 }
 0x219   : > { %s729_s24 = scalar_lea.sflag [#allocation4], %s728_s20 }
 0x21a   : > { %p867_p6 = pneg %p866_p5 }
 0x21c   : > { %1050 = dma.done.wait (%p867_p6), %s729_s24, 2048  }
 0x21d   : > { %1052 = vsyncadd (%p867_p6), %s729_s24, 4294965248  ;;  %s25_s26 = sadd.s32 1, %s1075_s26   ;;  %s1391_s13 = sld [smem:[#allocation11_spill]] }
 0x21e   : > { %p22_p4 = scmp.ge.s32.totalorder %s25_s26, 4   ;;  %s1392_s23 = sld [smem:[#allocation13_spill]] }
 0x21f   : > { %s1393_s10 = sld [smem:[#allocation12_spill]]  ;;  %s1394_s21 = smov %s1059_s22 }
 0x220   : > { %s1396_s24 = smov %s1071_s25 }
 0x221   :  { %24 = sbr.rel (!%p22_p4) target bundleno = 10 (0xa), region = 102 }
 0x223   : > { %s1395_s22 = smov %s1391_s13 }
 0x225   : > { %s1397_s25 = smov %s1393_s10 }
 0x226   :  { %734 = vsyncpa [#allocation3], 1 }
 0x227   :  { %736 = vsyncpa [#allocation3 + $0x1], 1 }
 0x228   :  { %737 = vsyncpa [#allocation6], 1 }
 0x229   :  { %739 = vsyncpa [#allocation6 + $0x1], 1 }
 0x22a   :  { %740 = vsyncpa [#allocation4], 1 }
 0x22b   :  { %742 = vsyncpa [#allocation4 + $0x1], 1 }

</bundles_post_ra>
